<compile_context>
chip_gen: v7x
topology: tpu7x:2x2x1
jax: 0.10.0
libtpu: 0.0.40
codegen_flags: <defaults>
</compile_context>

<pallas_src>
import functools

import jax
import jax.numpy as jnp
import numpy as np
from jax.experimental import pallas as pl
from jax.experimental.pallas import tpu as pltpu

_LANE = 128                      # vreg lane width (f32)
_SUBLANE = 8                     # f32 sublane count
_STEP_OVERHEAD_US = 0.35         # measured per-grid-step overhead
_HBM_BYTES_PER_US = 1.0e6        # ~1 TB/s HBM write BW (conservative, v5e-ish)
_MAX_BLOCK_BYTES = 4 << 20       # => double-buffered output block <= 8 MiB


def _round_up(x, m):
    return ((x + m - 1) // m) * m


def _cdiv(a, b):
    return -(-a // b)


def _anchor_kernel(lvl_ref, row_ref, lane_ref, xterm_ref, ymul_ref, out_ref,
                   *, h_tile):
    """Fill one (h_tile, lane_tile) work tile of the anchor slab.

    Per level the slab plane holds the row-major flat (H, 4*W) view of the
    (H*W, 4) anchor matrix: element (y, 4*x + k) is coordinate k of grid
    location (y, x).  All per-lane periodic structure is precomputed into
    xterm/ymul, so the per-element work is one multiply + one add + one
    unmasked store.

      lvl_ref / row_ref / lane_ref : SMEM int32 work-list tables (consumed by
                                     the index_maps; row_ref also provides the
                                     row offset of this tile)
      xterm_ref / ymul_ref         : VMEM (1, lane_tile) per-level lane rows
      out_ref                      : VMEM (h_tile, lane_tile) output tile
    """
    del lvl_ref, lane_ref  # only used by the index_maps
    t = pl.program_id(0)
    row0 = row_ref[t] * h_tile                               # SMEM scalar
    r = jax.lax.broadcasted_iota(jnp.int32, (h_tile, 1), 0)
    y = (r + row0).astype(jnp.float32)                       # (h_tile, 1)
    out_ref[...] = y * ymul_ref[...] + xterm_ref[...]        # 1 vmul + 1 vadd


def _choose_tiles(levels):
    """Pick (h_tile, lane_tile) from the static grid sizes.

    Minimizes  steps * 0.35us  +  padded_bytes / HBM_BW, with a 2x credit
    (v7x's two TensorCores) once there are >= 4 homogeneous tiles.  The output
    block is capped so that the double-buffered pair stays <= 8 MiB (safe under
    v5e's 16 MiB scoped-VMEM default and v7x's 32 MiB default / 64 MiB part).
    """
    h_max = max(h for h, _ in levels)
    w4s = [_round_up(4 * w, _LANE) for _, w in levels]
    w4_max = max(w4s)

    h_cap = _round_up(h_max, _SUBLANE)
    h_cands = sorted({min(_round_up(c, _SUBLANE), h_cap)
                      for c in (8, 16, 32, 64, 128, 256, 512, h_max)})
    l_cands = sorted({min(_round_up(c, _LANE), w4_max)
                      for c in (128, 256, 512, 1024, 2048, w4_max)})

    best_key, best = None, None
    for ht in h_cands:
        for lt in l_cands:
            if ht * lt * 4 > _MAX_BLOCK_BYTES:
                continue
            steps = sum(_cdiv(h, ht) * _cdiv(w4, lt)
                        for (h, _), w4 in zip(levels, w4s))
            nbytes = steps * ht * lt * 4
            serial_us = steps * _STEP_OVERHEAD_US + nbytes / _HBM_BYTES_PER_US
            par = 2.0 if steps >= 4 else 1.0   # megacore split of the 1-D grid
            key = (serial_us / par, -(ht * lt))  # tie-break: bigger blocks
            if best_key is None or key < best_key:
                best_key, best = key, (ht, lt)
    return best


@functools.lru_cache(maxsize=None)
def _build_generator(levels, strides, bases):
    """Build a cached, jitted anchor generator for one static configuration.

    levels  : tuple of (H, W) ints
    strides : tuple of (stride_h, stride_w) ints
    bases   : tuple of (bx0, by0, bx1, by1) floats
    Returns fn() -> tuple of (H_l*W_l, 4) float32 arrays.
    """
    num_levels = len(levels)
    h_tile, lane_tile = _choose_tiles(levels)

    w4s = [_round_up(4 * w, _LANE) for _, w in levels]
    n_row = [_cdiv(h, h_tile) for h, _ in levels]
    n_lane = [_cdiv(w4, lane_tile) for w4 in w4s]
    h_slab = max(n_row) * h_tile
    w_slab = max(n_lane) * lane_tile

    # Work list: one entry per real (level, row_block, lane_block) tile.
    work = [(l, rb, lb)
            for l in range(num_levels)
            for rb in range(n_row[l])
            for lb in range(n_lane[l])]
    tile_lvl = np.array([t[0] for t in work], dtype=np.int32)
    tile_row = np.array([t[1] for t in work], dtype=np.int32)
    tile_lane = np.array([t[2] for t in work], dtype=np.int32)
    num_tiles = len(work)

    # Hoisted per-level lane patterns.  For lane c = 4*x + k within a level:
    #   x_term[c] = base[k] + x*stride_w   if k in {0, 2}   else base[k]
    #   y_mul [c] = 0                      if k in {0, 2}   else stride_h
    # so  anchor(y, c) = y * y_mul[c] + x_term[c].
    xterm = np.zeros((num_levels, 1, w_slab), dtype=np.float32)
    ymul = np.zeros((num_levels, 1, w_slab), dtype=np.float32)
    for l, ((_, w), (sh, sw), base) in enumerate(zip(levels, strides, bases)):
        base = np.asarray(base, dtype=np.float32)
        c = np.arange(4 * w, dtype=np.int64)
        k = c & 3
        x = (c >> 2).astype(np.float32)
        is_x = (k % 2) == 0
        xterm[l, 0, :4 * w] = (base[k] +
                               np.where(is_x, x * np.float32(sw),
                                        np.float32(0.0))).astype(np.float32)
        ymul[l, 0, :4 * w] = np.where(is_x, np.float32(0.0),
                                      np.float32(sh)).astype(np.float32)

    def _lane_map(t, lvl, row, lane):      # (L, 1, w_slab) lane-pattern tables
        return (lvl[t], 0, lane[t])

    def _out_map(t, lvl, row, lane):       # (L, h_slab, w_slab) output slab
        return (lvl[t], row[t], lane[t])

    grid_spec = pltpu.PrefetchScalarGridSpec(
        num_scalar_prefetch=3,
        grid=(num_tiles,),
        in_specs=[
            pl.BlockSpec((None, 1, lane_tile), _lane_map),   # x_term
            pl.BlockSpec((None, 1, lane_tile), _lane_map),   # y_mul
        ],
        out_specs=pl.BlockSpec((None, h_tile, lane_tile), _out_map),
    )

    paller = pl.pallas_call(
        functools.partial(_anchor_kernel, h_tile=h_tile),
        out_shape=jax.ShapeDtypeStruct((num_levels, h_slab, w_slab),
                                       jnp.float32),
        grid_spec=grid_spec,
        compiler_params=pltpu.CompilerParams(
            dimension_semantics=("parallel",)),
    )

    def run(tile_lvl, tile_row, tile_lane, xterm, ymul):
        slab = paller(tile_lvl, tile_row, tile_lane, xterm, ymul)
        outs = []
        for l, (h, w) in enumerate(levels):
            # The row-major (h, 4w) prefix of the level's slab plane is exactly
            # the flat layout of (h*w, 4).  When 4*w equals its padded lane
            # width this is a free reshape; otherwise XLA fuses a single copy
            # of only the useful bytes.  Everything lives inside ONE jitted
            # executable, so there are no extra per-level dispatches.
            outs.append(slab[l, :h, :4 * w].reshape(h * w, 4))
        return tuple(outs)

    run = jax.jit(run)

    def generate():
        return run(tile_lvl, tile_row, tile_lane, xterm, ymul)

    return generate


class AnchorGenerator:
    """JAX/Pallas port of the PyTorch AnchorGenerator module."""

    def __init__(self, sizes):
        self.sizes = jnp.asarray(sizes, dtype=jnp.float32)
        self.strides = None
        # cell_anchor: round([-s, -s, s, s] / 2); np.round matches torch.round
        # (round-half-to-even).
        self._bases = tuple(
            tuple(float(v) for v in
                  np.round(np.array([-s, -s, s, s], dtype=np.float32) / 2.0))
            for s in np.asarray(sizes, dtype=np.float32))
        self.cell_anchors = [jnp.asarray(b, dtype=jnp.float32)
                             for b in self._bases]

    def __call__(self, image_size, grid_sizes):
        return self.forward(image_size, grid_sizes)

    def forward(self, image_size, grid_sizes):
        if len(self.cell_anchors) != len(grid_sizes):
            raise ValueError('sizes 和 grid 长度不一')
        levels = tuple((int(g[0]), int(g[1])) for g in grid_sizes)
        strides = tuple((int(image_size[0]) // h, int(image_size[1]) // w)
                        for h, w in levels)
        self.strides = jnp.asarray(strides, dtype=jnp.float32)
        generate = _build_generator(levels, strides, self._bases)
        return list(generate())


def _reference_anchors(image_size, grid_sizes, sizes):
    """Pure numpy reference reproducing the PyTorch semantics."""
    out = []
    for (gh, gw), s in zip(grid_sizes, sizes):
        sh = image_size[0] // gh
        sw = image_size[1] // gw
        base = np.round(np.array([-s, -s, s, s], dtype=np.float32) / 2.0)
        xs = np.arange(gw, dtype=np.float32) * sw
        ys = np.arange(gh, dtype=np.float32) * sh
        sy, sx = np.meshgrid(ys, xs, indexing='ij')
        shifts = np.stack([sx.reshape(-1), sy.reshape(-1)], axis=1)
        shifts = np.tile(shifts, (1, 2))  # repeat([1, 2])
        anchors = (shifts.reshape(-1, 1, 4) + base.reshape(1, -1, 4)).reshape(
            -1, 4)
        out.append(anchors.astype(np.float32))
    return out


if __name__ == "__main__":
    key = jax.random.PRNGKey(0)
    k1, k2 = jax.random.split(key)

    # Small NCHW feature maps; only their spatial dims drive the anchors.
    feat_p3 = jax.random.normal(k1, (2, 4, 16, 16), dtype=jnp.float32)
    feat_p4 = jax.random.normal(k2, (2, 4, 8, 8), dtype=jnp.float32)

    image_size = (64, 64)
    grid_sizes = [list(feat_p3.shape[-2:]), list(feat_p4.shape[-2:])]
    sizes = [8.0, 16.0]

    gen = AnchorGenerator(sizes)
    anchors = gen(image_size, grid_sizes)
    anchors = [jax.block_until_ready(a) for a in anchors]

    ref = _reference_anchors(image_size, grid_sizes, sizes)
    for a, r in zip(anchors, ref):
        assert a.shape == r.shape, (a.shape, r.shape)
        np.testing.assert_allclose(np.asarray(a), r, rtol=0, atol=0)

    print("KERNEL_OK")
</pallas_src>

<mosaic_0001>
module attributes {stable_mosaic.version = 11 : i64} {
  func.func @_anchor_kernel(%arg0: i32, %arg1: memref<2xi32, #tpu.memory_space<smem>>, %arg2: memref<2xi32, #tpu.memory_space<smem>>, %arg3: memref<2xi32, #tpu.memory_space<smem>>, %arg4: memref<1x1x128xf32, #tpu.memory_space<vmem>>, %arg5: memref<1x1x128xf32, #tpu.memory_space<vmem>>, %arg6: memref<1x16x128xf32, #tpu.memory_space<vmem>>) attributes {dimension_semantics = [#tpu.dimension_semantics<parallel>], iteration_bounds = array<i64: 2>, scalar_prefetch = 3 : i64, scratch_operands = 0 : i64, tpu.core_type = #tpu.core_type<tc>, window_params = [{transform_indices = @transform_0, window_bounds = array<i64: 1, 1, 128>}, {transform_indices = @transform_1, window_bounds = array<i64: 1, 1, 128>}, {transform_indices = @transform_2, window_bounds = array<i64: 1, 16, 128>}]} {
    %0 = arith.index_cast %arg0 : i32 to index
    %1 = memref.load %arg2[%0] : memref<2xi32, #tpu.memory_space<smem>>
    %c16_i32 = arith.constant 16 : i32
    %2 = arith.muli %1, %c16_i32 : i32
    %3 = tpu.iota {dimensions = array<i32: 0>} : vector<16x1xi32>
    %4 = vector.broadcast %2 : i32 to vector<16x1xi32>
    %5 = arith.addi %3, %4 : vector<16x1xi32>
    %6 = arith.sitofp %5 : vector<16x1xi32> to vector<16x1xf32>
    %c0 = arith.constant 0 : index
    %c0_0 = arith.constant 0 : index
    %c0_1 = arith.constant 0 : index
    %7 = vector.load %arg5[%c0, %c0_0, %c0_1] : memref<1x1x128xf32, #tpu.memory_space<vmem>>, vector<1x1x128xf32>
    %8 = vector.shape_cast %7 : vector<1x1x128xf32> to vector<1x128xf32>
    %9 = vector.broadcast %6 : vector<16x1xf32> to vector<16x128xf32>
    %10 = vector.broadcast %8 : vector<1x128xf32> to vector<16x128xf32>
    %11 = arith.mulf %9, %10 : vector<16x128xf32>
    %c0_2 = arith.constant 0 : index
    %c0_3 = arith.constant 0 : index
    %c0_4 = arith.constant 0 : index
    %12 = vector.load %arg4[%c0_2, %c0_3, %c0_4] : memref<1x1x128xf32, #tpu.memory_space<vmem>>, vector<1x1x128xf32>
    %13 = vector.shape_cast %12 : vector<1x1x128xf32> to vector<1x128xf32>
    %14 = vector.broadcast %13 : vector<1x128xf32> to vector<16x128xf32>
    %15 = arith.addf %11, %14 : vector<16x128xf32>
    %c0_5 = arith.constant 0 : index
    %c0_6 = arith.constant 0 : index
    %c0_7 = arith.constant 0 : index
    %16 = vector.load %arg6[%c0_5, %c0_6, %c0_7] : memref<1x16x128xf32, #tpu.memory_space<vmem>>, vector<1x16x128xf32>
    %17 = vector.shape_cast %16 : vector<1x16x128xf32> to vector<16x128xf32>
    %18 = vector.shape_cast %15 : vector<16x128xf32> to vector<1x16x128xf32>
    tpu.vector_store %arg6[%c0_5, %c0_6, %c0_7], %18 {strides = array<i32>} : memref<1x16x128xf32, #tpu.memory_space<vmem>>, vector<1x16x128xf32>,
    return
  }
  func.func @transform_0(%arg0: i32, %arg1: memref<2xi32, #tpu.memory_space<smem>>, %arg2: memref<2xi32, #tpu.memory_space<smem>>, %arg3: memref<2xi32, #tpu.memory_space<smem>>) -> (i32, i32, i32) {
    %0 = arith.index_cast %arg0 : i32 to index
    %1 = memref.load %arg1[%0] : memref<2xi32, #tpu.memory_space<smem>>
    %2 = arith.index_cast %arg0 : i32 to index
    %3 = memref.load %arg3[%2] : memref<2xi32, #tpu.memory_space<smem>>
    %c0_i32 = arith.constant 0 : i32
    %c0_i32_0 = arith.constant 0 : i32
    return %1, %c0_i32, %3 : i32, i32, i32
  }
  func.func @transform_1(%arg0: i32, %arg1: memref<2xi32, #tpu.memory_space<smem>>, %arg2: memref<2xi32, #tpu.memory_space<smem>>, %arg3: memref<2xi32, #tpu.memory_space<smem>>) -> (i32, i32, i32) {
    %0 = arith.index_cast %arg0 : i32 to index
    %1 = memref.load %arg1[%0] : memref<2xi32, #tpu.memory_space<smem>>
    %2 = arith.index_cast %arg0 : i32 to index
    %3 = memref.load %arg3[%2] : memref<2xi32, #tpu.memory_space<smem>>
    %c0_i32 = arith.constant 0 : i32
    %c0_i32_0 = arith.constant 0 : i32
    return %1, %c0_i32, %3 : i32, i32, i32
  }
  func.func @transform_2(%arg0: i32, %arg1: memref<2xi32, #tpu.memory_space<smem>>, %arg2: memref<2xi32, #tpu.memory_space<smem>>, %arg3: memref<2xi32, #tpu.memory_space<smem>>) -> (i32, i32, i32) {
    %0 = arith.index_cast %arg0 : i32 to index
    %1 = memref.load %arg1[%0] : memref<2xi32, #tpu.memory_space<smem>>
    %2 = arith.index_cast %arg0 : i32 to index
    %3 = memref.load %arg2[%2] : memref<2xi32, #tpu.memory_space<smem>>
    %4 = arith.index_cast %arg0 : i32 to index
    %5 = memref.load %arg3[%4] : memref<2xi32, #tpu.memory_space<smem>>
    %c0_i32 = arith.constant 0 : i32
    return %1, %3, %5 : i32, i32, i32
  }
}

</mosaic_0001>

<bundles_post_ra>
// kernel: squeeze.3
= control target key start
LH: loop header
LB: loop body
LE: loop exit
PB: predicated region body
PF: predicated region fallthrough
CT: control target
= control target key end

     0   :  { %vm3_vm0 = vcmask 31744   ;;  %s84_s8 = smov 116   ;;  %s85_s13 = smov 120   ;;  %s167_s0 = inlined_call_operand.vmem [shape: f32[1,8,32], index: 0, kind: input, shape index: {}]   ;;  %s168_s1 = inlined_call_operand.vmem [shape: f32[64,4], index: 1, kind: output, shape index: {}]  }
   0x1   :  { %v6_v0 = vld [vmem:[%s167_s0] sm:$0xff]   ;;  %s83_s0 = smov 124   ;;  %s86_s14 = smov 112  }
   0x2   :  { %7 = vrot.lane.b32.xlu0 %v6_v0, %s83_s0  ;;  %23 = vrot.lane.b32.xlu1 %v6_v0, %s84_s8  ;;  %4 = vst.msk [vmem:[%s168_s1] ss:$8 sm:$0xf] %vm3_vm0, %v6_v0   ;;  %5 = vst.msk [vmem:[%s168_s1] ss:$8 sm:$0xf0] %vm3_vm0, %v6_v0  }
   0x3   :  { %s87_s15 = smov 108   ;;  %s88_s16 = smov 104  }
   0x4   :  { %s89_s17 = smov 100  }
   0x6   :  { %15 = vrot.lane.b32.xlu0 %v6_v0, %s85_s13  ;;  %31 = vrot.lane.b32.xlu1 %v6_v0, %s86_s14 }
   0xa   :  { %39 = vrot.lane.b32.xlu0 %v6_v0, %s87_s15  ;;  %47 = vrot.lane.b32.xlu1 %v6_v0, %s88_s16 }
   0xe   :  { %55 = vrot.lane.b32.xlu0 %v6_v0, %s89_s17 }
  0x74   :  { %v8_v1 = vpop.permute.xlu0 %7   ;;  %v24_v2 = vpop.permute.xlu1 %23  }
  0x75   :  { %62 = vst.msk [vmem:[%s168_s1 + $0x1] ss:$8 sm:$0xf] %vm3_vm0, %v8_v1   ;;  %63 = vst.msk [vmem:[%s168_s1 + $0x1] ss:$8 sm:$0xf0] %vm3_vm0, %v8_v1  }
  0x76   :  { %66 = vst.msk [vmem:[%s168_s1 + $0x3] ss:$8 sm:$0xf] %vm3_vm0, %v24_v2   ;;  %67 = vst.msk [vmem:[%s168_s1 + $0x3] ss:$8 sm:$0xf0] %vm3_vm0, %v24_v2  }
  0x78   :  { %v16_v3 = vpop.permute.xlu0 %15   ;;  %v32_v4 = vpop.permute.xlu1 %31  }
  0x79   :  { %64 = vst.msk [vmem:[%s168_s1 + $0x2] ss:$8 sm:$0xf] %vm3_vm0, %v16_v3   ;;  %65 = vst.msk [vmem:[%s168_s1 + $0x2] ss:$8 sm:$0xf0] %vm3_vm0, %v16_v3  }
  0x7a   :  { %68 = vst.msk [vmem:[%s168_s1 + $0x4] ss:$8 sm:$0xf] %vm3_vm0, %v32_v4   ;;  %69 = vst.msk [vmem:[%s168_s1 + $0x4] ss:$8 sm:$0xf0] %vm3_vm0, %v32_v4  }
  0x7c   :  { %v40_v5 = vpop.permute.xlu0 %39   ;;  %v48_v6 = vpop.permute.xlu1 %47  }
  0x7d   :  { %70 = vst.msk [vmem:[%s168_s1 + $0x5] ss:$8 sm:$0xf] %vm3_vm0, %v40_v5   ;;  %71 = vst.msk [vmem:[%s168_s1 + $0x5] ss:$8 sm:$0xf0] %vm3_vm0, %v40_v5  }
  0x7e   :  { %72 = vst.msk [vmem:[%s168_s1 + $0x6] ss:$8 sm:$0xf] %vm3_vm0, %v48_v6   ;;  %73 = vst.msk [vmem:[%s168_s1 + $0x6] ss:$8 sm:$0xf0] %vm3_vm0, %v48_v6  }
  0x80   :  { %v56_v7 = vpop.permute.xlu0 %55  }
  0x81   :  { %74 = vst.msk [vmem:[%s168_s1 + $0x7] ss:$8 sm:$0xf] %vm3_vm0, %v56_v7   ;;  %75 = vst.msk [vmem:[%s168_s1 + $0x7] ss:$8 sm:$0xf0] %vm3_vm0, %v56_v7  }

// kernel: squeeze.2
= control target key start
LH: loop header
LB: loop body
LE: loop exit
PB: predicated region body
PF: predicated region fallthrough
CT: control target
= control target key end

     0   :  { %vm3_vm0 = vcmask 31744   ;;  %s550_s10 = smov 124   ;;  %s551_s27 = smov 116   ;;  %s1092_s0 = inlined_call_operand.vmem [shape: f32[1,16,64], index: 0, kind: input, shape index: {}]   ;;  %s1093_s1 = inlined_call_operand.vmem [shape: f32[256,4], index: 1, kind: output, shape index: {}]  }
   0x1   :  { %v44_v0 = vld [vmem:[%s1092_s0] sm:$0xff]   ;;  %v412_v1 = vld [vmem:[%s1092_s0 + $0x8] sm:$0xff]   ;;  %s549_s0 = smov 120   ;;  %s552_s28 = smov 112  }
   0x2   :  { %45 = vrot.lane.b32.xlu1 %v44_v0, %s549_s0  ;;  %20 = vrot.lane.b32.xlu0 %v44_v0, %s550_s10  ;;  %4 = vst.msk [vmem:[%s1093_s1] ss:$16 sm:$0x3] %vm3_vm0, %v44_v0   ;;  %5 = vst.msk [vmem:[%s1093_s1] ss:$16 sm:$0xc] %vm3_vm0, %v44_v0  }
   0x3   :  { %6 = vst.msk [vmem:[%s1093_s1] ss:$16 sm:$0x30] %vm3_vm0, %v44_v0   ;;  %7 = vst.msk [vmem:[%s1093_s1] ss:$16 sm:$0xc0] %vm3_vm0, %v44_v0  }
   0x4   :  { %395 = vst.msk [vmem:[%s1093_s1 + $0x80] ss:$16 sm:$0x3] %vm3_vm0, %v412_v1   ;;  %396 = vst.msk [vmem:[%s1093_s1 + $0x80] ss:$16 sm:$0xc] %vm3_vm0, %v412_v1  }
   0x5   :  { %397 = vst.msk [vmem:[%s1093_s1 + $0x80] ss:$16 sm:$0x30] %vm3_vm0, %v412_v1   ;;  %398 = vst.msk [vmem:[%s1093_s1 + $0x80] ss:$16 sm:$0xc0] %vm3_vm0, %v412_v1  }
   0x6   :  { %58 = vrot.lane.b32.xlu1 %v412_v1, %s549_s0  ;;  %33 = vrot.lane.b32.xlu0 %v412_v1, %s550_s10  ;;  %s553_s29 = smov 108   ;;  %s554_s30 = smov 104  }
   0x7   :  { %s555_s2 = smov 100   ;;  %s556_s3 = smov 96  }
   0x8   :  { %s557_s4 = smov 92   ;;  %s558_s5 = smov 88  }
   0x9   :  { %s559_s6 = smov 84   ;;  %s560_s7 = smov 80  }
   0xa   :  { %83 = vrot.lane.b32.xlu1 %v412_v1, %s551_s27  ;;  %70 = vrot.lane.b32.xlu0 %v44_v0, %s551_s27  ;;  %s561_s8 = smov 76   ;;  %s562_s9 = smov 72  }
   0xb   :  { %s563_s0 = smov 68  }
   0xe   :  { %108 = vrot.lane.b32.xlu1 %v412_v1, %s552_s28  ;;  %95 = vrot.lane.b32.xlu0 %v44_v0, %s552_s28 }
  0x12   :  { %133 = vrot.lane.b32.xlu1 %v412_v1, %s553_s29  ;;  %120 = vrot.lane.b32.xlu0 %v44_v0, %s553_s29 }
  0x16   :  { %158 = vrot.lane.b32.xlu1 %v412_v1, %s554_s30  ;;  %145 = vrot.lane.b32.xlu0 %v44_v0, %s554_s30 }
  0x1a   :  { %183 = vrot.lane.b32.xlu1 %v412_v1, %s555_s2  ;;  %170 = vrot.lane.b32.xlu0 %v44_v0, %s555_s2 }
  0x1e   :  { %208 = vrot.lane.b32.xlu1 %v412_v1, %s556_s3  ;;  %195 = vrot.lane.b32.xlu0 %v44_v0, %s556_s3 }
  0x22   :  { %233 = vrot.lane.b32.xlu1 %v412_v1, %s557_s4  ;;  %220 = vrot.lane.b32.xlu0 %v44_v0, %s557_s4 }
  0x26   :  { %258 = vrot.lane.b32.xlu1 %v412_v1, %s558_s5  ;;  %245 = vrot.lane.b32.xlu0 %v44_v0, %s558_s5 }
  0x2a   :  { %283 = vrot.lane.b32.xlu1 %v412_v1, %s559_s6  ;;  %270 = vrot.lane.b32.xlu0 %v44_v0, %s559_s6 }
  0x2e   :  { %308 = vrot.lane.b32.xlu1 %v412_v1, %s560_s7  ;;  %295 = vrot.lane.b32.xlu0 %v44_v0, %s560_s7 }
  0x32   :  { %333 = vrot.lane.b32.xlu1 %v412_v1, %s561_s8  ;;  %320 = vrot.lane.b32.xlu0 %v44_v0, %s561_s8 }
  0x36   :  { %358 = vrot.lane.b32.xlu1 %v412_v1, %s562_s9  ;;  %345 = vrot.lane.b32.xlu0 %v44_v0, %s562_s9 }
  0x3a   :  { %383 = vrot.lane.b32.xlu1 %v412_v1, %s563_s0  ;;  %370 = vrot.lane.b32.xlu0 %v44_v0, %s563_s0 }
  0x74   :  { %v46_v2 = vpop.permute.xlu1 %45   ;;  %v21_v3 = vpop.permute.xlu0 %20  }
  0x75   :  { %408 = vst.msk [vmem:[%s1093_s1 + $0x2] ss:$16 sm:$0x3] %vm3_vm0, %v46_v2   ;;  %409 = vst.msk [vmem:[%s1093_s1 + $0x2] ss:$16 sm:$0xc] %vm3_vm0, %v46_v2  }
  0x76   :  { %410 = vst.msk [vmem:[%s1093_s1 + $0x2] ss:$16 sm:$0x30] %vm3_vm0, %v46_v2   ;;  %411 = vst.msk [vmem:[%s1093_s1 + $0x2] ss:$16 sm:$0xc0] %vm3_vm0, %v46_v2  }
  0x77   :  { %399 = vst.msk [vmem:[%s1093_s1 + $0x1] ss:$16 sm:$0x3] %vm3_vm0, %v21_v3   ;;  %400 = vst.msk [vmem:[%s1093_s1 + $0x1] ss:$16 sm:$0xc] %vm3_vm0, %v21_v3  }
  0x78   :  { %401 = vst.msk [vmem:[%s1093_s1 + $0x1] ss:$16 sm:$0x30] %vm3_vm0, %v21_v3   ;;  %402 = vst.msk [vmem:[%s1093_s1 + $0x1] ss:$16 sm:$0xc0] %vm3_vm0, %v21_v3   ;;  %v59_v4 = vpop.permute.xlu1 %58   ;;  %v34_v5 = vpop.permute.xlu0 %33  }
  0x79   :  { %413 = vst.msk [vmem:[%s1093_s1 + $0x82] ss:$16 sm:$0x3] %vm3_vm0, %v59_v4   ;;  %414 = vst.msk [vmem:[%s1093_s1 + $0x82] ss:$16 sm:$0xc] %vm3_vm0, %v59_v4  }
  0x7a   :  { %415 = vst.msk [vmem:[%s1093_s1 + $0x82] ss:$16 sm:$0x30] %vm3_vm0, %v59_v4   ;;  %416 = vst.msk [vmem:[%s1093_s1 + $0x82] ss:$16 sm:$0xc0] %vm3_vm0, %v59_v4  }
  0x7b   :  { %404 = vst.msk [vmem:[%s1093_s1 + $0x81] ss:$16 sm:$0x3] %vm3_vm0, %v34_v5   ;;  %405 = vst.msk [vmem:[%s1093_s1 + $0x81] ss:$16 sm:$0xc] %vm3_vm0, %v34_v5  }
  0x7c   :  { %406 = vst.msk [vmem:[%s1093_s1 + $0x81] ss:$16 sm:$0x30] %vm3_vm0, %v34_v5   ;;  %407 = vst.msk [vmem:[%s1093_s1 + $0x81] ss:$16 sm:$0xc0] %vm3_vm0, %v34_v5   ;;  %v84_v6 = vpop.permute.xlu1 %83   ;;  %v71_v7 = vpop.permute.xlu0 %70  }
  0x7d   :  { %422 = vst.msk [vmem:[%s1093_s1 + $0x83] ss:$16 sm:$0x3] %vm3_vm0, %v84_v6   ;;  %423 = vst.msk [vmem:[%s1093_s1 + $0x83] ss:$16 sm:$0xc] %vm3_vm0, %v84_v6  }
  0x7e   :  { %424 = vst.msk [vmem:[%s1093_s1 + $0x83] ss:$16 sm:$0x30] %vm3_vm0, %v84_v6   ;;  %425 = vst.msk [vmem:[%s1093_s1 + $0x83] ss:$16 sm:$0xc0] %vm3_vm0, %v84_v6  }
  0x7f   :  { %417 = vst.msk [vmem:[%s1093_s1 + $0x3] ss:$16 sm:$0x3] %vm3_vm0, %v71_v7   ;;  %418 = vst.msk [vmem:[%s1093_s1 + $0x3] ss:$16 sm:$0xc] %vm3_vm0, %v71_v7  }
  0x80   :  { %419 = vst.msk [vmem:[%s1093_s1 + $0x3] ss:$16 sm:$0x30] %vm3_vm0, %v71_v7   ;;  %420 = vst.msk [vmem:[%s1093_s1 + $0x3] ss:$16 sm:$0xc0] %vm3_vm0, %v71_v7   ;;  %v109_v8 = vpop.permute.xlu1 %108   ;;  %v96_v9 = vpop.permute.xlu0 %95  }
  0x81   :  { %431 = vst.msk [vmem:[%s1093_s1 + $0x84] ss:$16 sm:$0x3] %vm3_vm0, %v109_v8   ;;  %432 = vst.msk [vmem:[%s1093_s1 + $0x84] ss:$16 sm:$0xc] %vm3_vm0, %v109_v8  }
  0x82   :  { %433 = vst.msk [vmem:[%s1093_s1 + $0x84] ss:$16 sm:$0x30] %vm3_vm0, %v109_v8   ;;  %434 = vst.msk [vmem:[%s1093_s1 + $0x84] ss:$16 sm:$0xc0] %vm3_vm0, %v109_v8  }
  0x83   :  { %426 = vst.msk [vmem:[%s1093_s1 + $0x4] ss:$16 sm:$0x3] %vm3_vm0, %v96_v9   ;;  %427 = vst.msk [vmem:[%s1093_s1 + $0x4] ss:$16 sm:$0xc] %vm3_vm0, %v96_v9  }
  0x84   :  { %428 = vst.msk [vmem:[%s1093_s1 + $0x4] ss:$16 sm:$0x30] %vm3_vm0, %v96_v9   ;;  %429 = vst.msk [vmem:[%s1093_s1 + $0x4] ss:$16 sm:$0xc0] %vm3_vm0, %v96_v9   ;;  %v134_v10 = vpop.permute.xlu1 %133   ;;  %v121_v11 = vpop.permute.xlu0 %120  }
  0x85   :  { %440 = vst.msk [vmem:[%s1093_s1 + $0x85] ss:$16 sm:$0x3] %vm3_vm0, %v134_v10   ;;  %441 = vst.msk [vmem:[%s1093_s1 + $0x85] ss:$16 sm:$0xc] %vm3_vm0, %v134_v10  }
  0x86   :  { %442 = vst.msk [vmem:[%s1093_s1 + $0x85] ss:$16 sm:$0x30] %vm3_vm0, %v134_v10   ;;  %443 = vst.msk [vmem:[%s1093_s1 + $0x85] ss:$16 sm:$0xc0] %vm3_vm0, %v134_v10  }
  0x87   :  { %435 = vst.msk [vmem:[%s1093_s1 + $0x5] ss:$16 sm:$0x3] %vm3_vm0, %v121_v11   ;;  %436 = vst.msk [vmem:[%s1093_s1 + $0x5] ss:$16 sm:$0xc] %vm3_vm0, %v121_v11  }
  0x88   :  { %437 = vst.msk [vmem:[%s1093_s1 + $0x5] ss:$16 sm:$0x30] %vm3_vm0, %v121_v11   ;;  %438 = vst.msk [vmem:[%s1093_s1 + $0x5] ss:$16 sm:$0xc0] %vm3_vm0, %v121_v11   ;;  %v159_v12 = vpop.permute.xlu1 %158   ;;  %v146_v13 = vpop.permute.xlu0 %145  }
  0x89   :  { %449 = vst.msk [vmem:[%s1093_s1 + $0x86] ss:$16 sm:$0x3] %vm3_vm0, %v159_v12   ;;  %450 = vst.msk [vmem:[%s1093_s1 + $0x86] ss:$16 sm:$0xc] %vm3_vm0, %v159_v12  }
  0x8a   :  { %451 = vst.msk [vmem:[%s1093_s1 + $0x86] ss:$16 sm:$0x30] %vm3_vm0, %v159_v12   ;;  %452 = vst.msk [vmem:[%s1093_s1 + $0x86] ss:$16 sm:$0xc0] %vm3_vm0, %v159_v12  }
  0x8b   :  { %444 = vst.msk [vmem:[%s1093_s1 + $0x6] ss:$16 sm:$0x3] %vm3_vm0, %v146_v13   ;;  %445 = vst.msk [vmem:[%s1093_s1 + $0x6] ss:$16 sm:$0xc] %vm3_vm0, %v146_v13  }
  0x8c   :  { %446 = vst.msk [vmem:[%s1093_s1 + $0x6] ss:$16 sm:$0x30] %vm3_vm0, %v146_v13   ;;  %447 = vst.msk [vmem:[%s1093_s1 + $0x6] ss:$16 sm:$0xc0] %vm3_vm0, %v146_v13   ;;  %v184_v14 = vpop.permute.xlu1 %183   ;;  %v171_v15 = vpop.permute.xlu0 %170  }
  0x8d   :  { %458 = vst.msk [vmem:[%s1093_s1 + $0x87] ss:$16 sm:$0x3] %vm3_vm0, %v184_v14   ;;  %459 = vst.msk [vmem:[%s1093_s1 + $0x87] ss:$16 sm:$0xc] %vm3_vm0, %v184_v14  }
  0x8e   :  { %460 = vst.msk [vmem:[%s1093_s1 + $0x87] ss:$16 sm:$0x30] %vm3_vm0, %v184_v14   ;;  %461 = vst.msk [vmem:[%s1093_s1 + $0x87] ss:$16 sm:$0xc0] %vm3_vm0, %v184_v14  }
  0x8f   :  { %453 = vst.msk [vmem:[%s1093_s1 + $0x7] ss:$16 sm:$0x3] %vm3_vm0, %v171_v15   ;;  %454 = vst.msk [vmem:[%s1093_s1 + $0x7] ss:$16 sm:$0xc] %vm3_vm0, %v171_v15  }
  0x90   :  { %455 = vst.msk [vmem:[%s1093_s1 + $0x7] ss:$16 sm:$0x30] %vm3_vm0, %v171_v15   ;;  %456 = vst.msk [vmem:[%s1093_s1 + $0x7] ss:$16 sm:$0xc0] %vm3_vm0, %v171_v15   ;;  %v209_v16 = vpop.permute.xlu1 %208   ;;  %v196_v17 = vpop.permute.xlu0 %195  }
  0x91   :  { %467 = vst.msk [vmem:[%s1093_s1 + $0x88] ss:$16 sm:$0x3] %vm3_vm0, %v209_v16   ;;  %468 = vst.msk [vmem:[%s1093_s1 + $0x88] ss:$16 sm:$0xc] %vm3_vm0, %v209_v16  }
  0x92   :  { %469 = vst.msk [vmem:[%s1093_s1 + $0x88] ss:$16 sm:$0x30] %vm3_vm0, %v209_v16   ;;  %470 = vst.msk [vmem:[%s1093_s1 + $0x88] ss:$16 sm:$0xc0] %vm3_vm0, %v209_v16  }
  0x93   :  { %462 = vst.msk [vmem:[%s1093_s1 + $0x8] ss:$16 sm:$0x3] %vm3_vm0, %v196_v17   ;;  %463 = vst.msk [vmem:[%s1093_s1 + $0x8] ss:$16 sm:$0xc] %vm3_vm0, %v196_v17  }
  0x94   :  { %464 = vst.msk [vmem:[%s1093_s1 + $0x8] ss:$16 sm:$0x30] %vm3_vm0, %v196_v17   ;;  %465 = vst.msk [vmem:[%s1093_s1 + $0x8] ss:$16 sm:$0xc0] %vm3_vm0, %v196_v17   ;;  %v234_v18 = vpop.permute.xlu1 %233   ;;  %v221_v19 = vpop.permute.xlu0 %220  }
  0x95   :  { %476 = vst.msk [vmem:[%s1093_s1 + $0x89] ss:$16 sm:$0x3] %vm3_vm0, %v234_v18   ;;  %477 = vst.msk [vmem:[%s1093_s1 + $0x89] ss:$16 sm:$0xc] %vm3_vm0, %v234_v18  }
  0x96   :  { %478 = vst.msk [vmem:[%s1093_s1 + $0x89] ss:$16 sm:$0x30] %vm3_vm0, %v234_v18   ;;  %479 = vst.msk [vmem:[%s1093_s1 + $0x89] ss:$16 sm:$0xc0] %vm3_vm0, %v234_v18  }
  0x97   :  { %471 = vst.msk [vmem:[%s1093_s1 + $0x9] ss:$16 sm:$0x3] %vm3_vm0, %v221_v19   ;;  %472 = vst.msk [vmem:[%s1093_s1 + $0x9] ss:$16 sm:$0xc] %vm3_vm0, %v221_v19  }
  0x98   :  { %473 = vst.msk [vmem:[%s1093_s1 + $0x9] ss:$16 sm:$0x30] %vm3_vm0, %v221_v19   ;;  %474 = vst.msk [vmem:[%s1093_s1 + $0x9] ss:$16 sm:$0xc0] %vm3_vm0, %v221_v19   ;;  %v259_v20 = vpop.permute.xlu1 %258   ;;  %v246_v21 = vpop.permute.xlu0 %245  }
  0x99   :  { %485 = vst.msk [vmem:[%s1093_s1 + $0x8a] ss:$16 sm:$0x3] %vm3_vm0, %v259_v20   ;;  %486 = vst.msk [vmem:[%s1093_s1 + $0x8a] ss:$16 sm:$0xc] %vm3_vm0, %v259_v20  }
  0x9a   :  { %487 = vst.msk [vmem:[%s1093_s1 + $0x8a] ss:$16 sm:$0x30] %vm3_vm0, %v259_v20   ;;  %488 = vst.msk [vmem:[%s1093_s1 + $0x8a] ss:$16 sm:$0xc0] %vm3_vm0, %v259_v20  }
  0x9b   :  { %480 = vst.msk [vmem:[%s1093_s1 + $0xa] ss:$16 sm:$0x3] %vm3_vm0, %v246_v21   ;;  %481 = vst.msk [vmem:[%s1093_s1 + $0xa] ss:$16 sm:$0xc] %vm3_vm0, %v246_v21  }
  0x9c   :  { %482 = vst.msk [vmem:[%s1093_s1 + $0xa] ss:$16 sm:$0x30] %vm3_vm0, %v246_v21   ;;  %483 = vst.msk [vmem:[%s1093_s1 + $0xa] ss:$16 sm:$0xc0] %vm3_vm0, %v246_v21   ;;  %v284_v22 = vpop.permute.xlu1 %283   ;;  %v271_v23 = vpop.permute.xlu0 %270  }
  0x9d   :  { %494 = vst.msk [vmem:[%s1093_s1 + $0x8b] ss:$16 sm:$0x3] %vm3_vm0, %v284_v22   ;;  %495 = vst.msk [vmem:[%s1093_s1 + $0x8b] ss:$16 sm:$0xc] %vm3_vm0, %v284_v22  }
  0x9e   :  { %496 = vst.msk [vmem:[%s1093_s1 + $0x8b] ss:$16 sm:$0x30] %vm3_vm0, %v284_v22   ;;  %497 = vst.msk [vmem:[%s1093_s1 + $0x8b] ss:$16 sm:$0xc0] %vm3_vm0, %v284_v22  }
  0x9f   :  { %489 = vst.msk [vmem:[%s1093_s1 + $0xb] ss:$16 sm:$0x3] %vm3_vm0, %v271_v23   ;;  %490 = vst.msk [vmem:[%s1093_s1 + $0xb] ss:$16 sm:$0xc] %vm3_vm0, %v271_v23  }
  0xa0   :  { %491 = vst.msk [vmem:[%s1093_s1 + $0xb] ss:$16 sm:$0x30] %vm3_vm0, %v271_v23   ;;  %492 = vst.msk [vmem:[%s1093_s1 + $0xb] ss:$16 sm:$0xc0] %vm3_vm0, %v271_v23   ;;  %v309_v24 = vpop.permute.xlu1 %308   ;;  %v296_v25 = vpop.permute.xlu0 %295  }
  0xa1   :  { %503 = vst.msk [vmem:[%s1093_s1 + $0x8c] ss:$16 sm:$0x3] %vm3_vm0, %v309_v24   ;;  %504 = vst.msk [vmem:[%s1093_s1 + $0x8c] ss:$16 sm:$0xc] %vm3_vm0, %v309_v24  }
  0xa2   :  { %505 = vst.msk [vmem:[%s1093_s1 + $0x8c] ss:$16 sm:$0x30] %vm3_vm0, %v309_v24   ;;  %506 = vst.msk [vmem:[%s1093_s1 + $0x8c] ss:$16 sm:$0xc0] %vm3_vm0, %v309_v24  }
  0xa3   :  { %498 = vst.msk [vmem:[%s1093_s1 + $0xc] ss:$16 sm:$0x3] %vm3_vm0, %v296_v25   ;;  %499 = vst.msk [vmem:[%s1093_s1 + $0xc] ss:$16 sm:$0xc] %vm3_vm0, %v296_v25  }
  0xa4   :  { %500 = vst.msk [vmem:[%s1093_s1 + $0xc] ss:$16 sm:$0x30] %vm3_vm0, %v296_v25   ;;  %501 = vst.msk [vmem:[%s1093_s1 + $0xc] ss:$16 sm:$0xc0] %vm3_vm0, %v296_v25   ;;  %v334_v26 = vpop.permute.xlu1 %333   ;;  %v321_v27 = vpop.permute.xlu0 %320  }
  0xa5   :  { %512 = vst.msk [vmem:[%s1093_s1 + $0x8d] ss:$16 sm:$0x3] %vm3_vm0, %v334_v26   ;;  %513 = vst.msk [vmem:[%s1093_s1 + $0x8d] ss:$16 sm:$0xc] %vm3_vm0, %v334_v26  }
  0xa6   :  { %514 = vst.msk [vmem:[%s1093_s1 + $0x8d] ss:$16 sm:$0x30] %vm3_vm0, %v334_v26   ;;  %515 = vst.msk [vmem:[%s1093_s1 + $0x8d] ss:$16 sm:$0xc0] %vm3_vm0, %v334_v26  }
  0xa7   :  { %507 = vst.msk [vmem:[%s1093_s1 + $0xd] ss:$16 sm:$0x3] %vm3_vm0, %v321_v27   ;;  %508 = vst.msk [vmem:[%s1093_s1 + $0xd] ss:$16 sm:$0xc] %vm3_vm0, %v321_v27  }
  0xa8   :  { %509 = vst.msk [vmem:[%s1093_s1 + $0xd] ss:$16 sm:$0x30] %vm3_vm0, %v321_v27   ;;  %510 = vst.msk [vmem:[%s1093_s1 + $0xd] ss:$16 sm:$0xc0] %vm3_vm0, %v321_v27   ;;  %v359_v28 = vpop.permute.xlu1 %358   ;;  %v346_v29 = vpop.permute.xlu0 %345  }
  0xa9   :  { %521 = vst.msk [vmem:[%s1093_s1 + $0x8e] ss:$16 sm:$0x3] %vm3_vm0, %v359_v28   ;;  %522 = vst.msk [vmem:[%s1093_s1 + $0x8e] ss:$16 sm:$0xc] %vm3_vm0, %v359_v28  }
  0xaa   :  { %523 = vst.msk [vmem:[%s1093_s1 + $0x8e] ss:$16 sm:$0x30] %vm3_vm0, %v359_v28   ;;  %524 = vst.msk [vmem:[%s1093_s1 + $0x8e] ss:$16 sm:$0xc0] %vm3_vm0, %v359_v28  }
  0xab   :  { %516 = vst.msk [vmem:[%s1093_s1 + $0xe] ss:$16 sm:$0x3] %vm3_vm0, %v346_v29   ;;  %517 = vst.msk [vmem:[%s1093_s1 + $0xe] ss:$16 sm:$0xc] %vm3_vm0, %v346_v29  }
  0xac   :  { %518 = vst.msk [vmem:[%s1093_s1 + $0xe] ss:$16 sm:$0x30] %vm3_vm0, %v346_v29   ;;  %519 = vst.msk [vmem:[%s1093_s1 + $0xe] ss:$16 sm:$0xc0] %vm3_vm0, %v346_v29   ;;  %v384_v30 = vpop.permute.xlu1 %383   ;;  %v371_v31 = vpop.permute.xlu0 %370  }
  0xad   :  { %530 = vst.msk [vmem:[%s1093_s1 + $0x8f] ss:$16 sm:$0x3] %vm3_vm0, %v384_v30   ;;  %531 = vst.msk [vmem:[%s1093_s1 + $0x8f] ss:$16 sm:$0xc] %vm3_vm0, %v384_v30  }
  0xae   :  { %532 = vst.msk [vmem:[%s1093_s1 + $0x8f] ss:$16 sm:$0x30] %vm3_vm0, %v384_v30   ;;  %533 = vst.msk [vmem:[%s1093_s1 + $0x8f] ss:$16 sm:$0xc0] %vm3_vm0, %v384_v30  }
  0xaf   :  { %525 = vst.msk [vmem:[%s1093_s1 + $0xf] ss:$16 sm:$0x3] %vm3_vm0, %v371_v31   ;;  %526 = vst.msk [vmem:[%s1093_s1 + $0xf] ss:$16 sm:$0xc] %vm3_vm0, %v371_v31  }
  0xb0   :  { %527 = vst.msk [vmem:[%s1093_s1 + $0xf] ss:$16 sm:$0x30] %vm3_vm0, %v371_v31   ;;  %528 = vst.msk [vmem:[%s1093_s1 + $0xf] ss:$16 sm:$0xc0] %vm3_vm0, %v371_v31  }

// kernel: run.1
= control target key start
LH: loop header
LB: loop body
LE: loop exit
PB: predicated region body
PF: predicated region fallthrough
CT: control target
= control target key end

     0   :  { %s523_s0 = inlined_call_operand.hbm [shape: s32[2], index: 0, kind: input, shape index: {}]   ;;  %s524_s3 = inlined_call_operand.vmem [shape: f32[2,1,128], index: 3, kind: input, shape index: {}]   ;;  %s525_s4 = inlined_call_operand.vmem [shape: f32[2,1,128], index: 4, kind: input, shape index: {}]   ;;  %s526_s5 = inlined_call_operand.vmem [shape: f32[2,16,128], index: 5, kind: output, shape index: {}]   ;;  %s527_s1 = inlined_call_operand.vmem [shape: s32[2], index: 1, kind: input, shape index: {}]   ;;  %s528_s2 = inlined_call_operand.vmem [shape: s32[2], index: 2, kind: input, shape index: {}]  }
   0x1   :  { %s408_s20 = scalar_lea.hbm %s523_s0, 16 }
   0x2   :  { %p409_p0 = scmp.ne.s32.totalorder %s523_s0, %s408_s20  ;;  %p412_p1 = scmp.lt.u32.totalorder %s408_s20, %s523_s0 }
   0x4   :  { %p414_p2 = pnand %p412_p1, %p409_p0 }
   0x6   :  { %417 = shalt.err (!%p414_p2)  }
   0x7   :  { %s452_s25 = smov [#allocation3]   ;;  %s12_s30 = sshll.u32 %s527_s1, 4  ;;  %s13_s30 = int_to_ptr.vmem [resolvable:$true] %s12_s30 }
   0x8   :  { %11 = dma.hbm_to_smem %s523_s0, 16, %s452_s25, [#allocation2] }
   0x9   :  { %s16_s8 = sshll.u32 %s528_s2, 4  ;;  %s418_s9 = scalar_lea.vmem %s13_s30, 16  ;;  %s17_s8 = int_to_ptr.vmem [resolvable:$true] %s16_s8 }
   0xa   :  { %p419_p3 = scmp.ne.s32.totalorder %s13_s30, %s418_s9  ;;  %p423_p4 = scmp.lt.s32.totalorder %s13_s30, %s13_s30 }
   0xb   :  { %p424_p5 = scmp.lt.s32.totalorder %s418_s9, %s418_s9 }
   0xd   :  { %p425_p6 = por %p424_p5, %p423_p4 }
   0xf   :  { %p426_p7 = pnand %p425_p6, %p419_p3 }
  0x11   :  { %429 = shalt.err (!%p426_p7)  }
  0x12   :  { %s453_s10 = smov [#allocation4]   ;;  %s430_s0 = scalar_lea.vmem %s17_s8, 16 }
  0x13   :  { %15 = dma.vmem_to_smem %s13_s30, 16, %s453_s10, [#allocation2] }
  0x14   :  { %p431_p8 = scmp.ne.s32.totalorder %s17_s8, %s430_s0  ;;  %p435_p9 = scmp.lt.s32.totalorder %s17_s8, %s17_s8 }
  0x15   :  { %p436_p10 = scmp.lt.s32.totalorder %s430_s0, %s430_s0 }
  0x17   :  { %p437_p11 = por %p436_p10, %p435_p9 }
  0x19   :  { %p438_p12 = pnand %p437_p11, %p431_p8 }
  0x1b   :  { %441 = shalt.err (!%p438_p12)  }
  0x1c   :  { %s454_s1 = smov [#allocation5]  }
  0x1d   :  { %19 = dma.vmem_to_smem %s17_s8, 16, %s454_s1, [#allocation2] }
  0x1e   :  { %446 = dma.done.wait [#allocation2], 48 }
  0x1f   :  { %447 = vsyncadd [#allocation2], 4294967248 }
  0x20   :  { %21 = sfence }
  0x21   :  { %s503_s2 = smov 0  }
  0x22 LB: > { %s384_s11 = sadd.s32 4294967295, %s450_s2   ;;  %p388_p13 = scmp.ge.s32.totalorder %s450_s2, 1  ;;  %s450_s2 = sphi %s503_s2, %s27_s2  }
  0x23   : > { %p169_p0 = scmp.lt.s32.totalorder %s450_s2, 3 }
  0x25   : > { %p170_p1 = pnand %p388_p13, %p169_p0 }
  0x26   : > { %s212_s12 = sld [smem:[#allocation3 + %s384_s11]] (!%p170_p1)  ;;  %v253_v0 = vlaneseq (!%p170_p1) }
  0x27   : > { %173 = sbr.rel (%p170_p1) target bundleno = 65 (0x41), region = 28  ;;  %s213_s13 = sld [smem:[#allocation5 + %s384_s11]] (!%p170_p1) }
  0x28   : > { %s222_s14 = sld [smem:[#allocation3 + %s384_s11]] (!%p170_p1)  ;;  %v254_v1 = vshrl.u32 (!%p170_p1), %v253_v0, 7 }
  0x29   : > { %s223_s15 = sld [smem:[#allocation5 + %s384_s11]] (!%p170_p1) }
  0x2a   : > { %s232_s16 = sld [smem:[#allocation3 + %s384_s11]] (!%p170_p1)  ;;  %v255_v2 = vadd.s32 (!%p170_p1), 8, %v254_v1 }
  0x2b   : > { %s233_s17 = sld [smem:[#allocation4 + %s384_s11]] (!%p170_p1) }
  0x2c   : > { %s234_s18 = sld [smem:[#allocation5 + %s384_s11]] (!%p170_p1)  ;;  %p214_p2 = scmp.lt.s32.totalorder (!%p170_p1), %s212_s12, 1 }
  0x2d   : > { %p216_p3 = scmp.lt.s32.totalorder (!%p170_p1), %s213_s13, 0  ;;  %s251_s20 = sld [smem:[#allocation4 + %s384_s11]] (!%p170_p1) }
  0x2e   : > { %p224_p4 = scmp.lt.s32.totalorder %s222_s14, 1  ;;  %s530_s12 = smov (!%p214_p2, %s212_s12), 1 }
  0x2f   : > { %p226_p5 = scmp.lt.s32.totalorder %s223_s15, 0  ;;  %s532_s13 = smov (!%p216_p3, %s213_s13), 0 }
  0x30   : > { %s534_s14 = smov (!%p224_p4, %s222_s14), 1  ;;  %s218_s19 = sadd.s32 %s532_s13, %s530_s12 }
  0x31   : > { %s389_s21 = sshll.u32 %s233_s17, 1  ;;  %p236_p6 = scmp.lt.s32.totalorder %s232_s16, 1 }
  0x32   : > { %s536_s15 = smov (!%p226_p5, %s223_s15), 0  ;;  %p238_p7 = scmp.lt.s32.totalorder %s389_s21, 1 }
  0x33   : > { %s538_s16 = smov (!%p236_p6, %s232_s16), 1  ;;  %s228_s22 = sadd.s32 %s536_s15, %s534_s14 }
  0x34   : > { %s229_s25 = scalar_lea.vmem %s525_s4, %s228_s22  ;;  %p240_p8 = scmp.lt.s32.totalorder %s234_s18, 0 }
  0x35   : > { %s540_s21 = smov (!%p238_p7, %s389_s21), 1  ;;  %s390_s26 = sshll.u32 %s538_s16, 1  ;;  %v393_v6 = vld [vmem:[%s229_s25] ss:$0 sm:$0xff] }
  0x36   : > { %s542_s18 = smov (!%p240_p8, %s234_s18), 0  ;;  %s392_s27 = sshll.u32 %s251_s20, 4 }
  0x37   : > { %s242_s28 = sadd.s32 %s542_s18, %s540_s21  ;;  %v256_v3 = vstv %s392_s27  ;;  %s219_s6 = scalar_lea.vmem %s524_s3, %s218_s19 }
  0x38   : > { %s244_s7 = sadd.s32 %s390_s26, %s242_s28  ;;  %v257_v4 = vadd.s32 %v256_v3, %v254_v1  ;;  %v258_v5 = vadd.s32 %v256_v3, %v255_v2  ;;  %v394_v9 = vld [vmem:[%s219_s6] ss:$0 sm:$0xff] }
  0x39   : > { %s391_s8 = sshll.u32 %s244_s7, 3 }
  0x3a   : > { %v259_v7 = vcvt.s32.f32 %v257_v4  ;;  %v260_v8 = vcvt.s32.f32 %v258_v5  ;;  %s246_s0 = scalar_lea.vmem %s526_s5, %s391_s8 }
  0x3c   : > { %v268_v10 = vmul.f32 %v393_v6, %v259_v7  ;;  %v269_v11 = vmul.f32 %v393_v6, %v260_v8 }
  0x3e   : > { %v277_v12 = vadd.f32 %v394_v9, %v268_v10  ;;  %v278_v13 = vadd.f32 %v394_v9, %v269_v11 }
  0x40   : > { %279 = vst [vmem:[%s246_s0] sm:$0xff] %v277_v12  ;;  %280 = vst [vmem:[%s246_s0 + $0x8] sm:$0xff] %v278_v13 }
  0x41 PF: > { %s27_s2 = sadd.s32 1, %s450_s2  }
  0x42   : > { %p24_p9 = scmp.ge.s32.totalorder %s27_s2, 4  }
  0x44   :  { %26 = sbr.rel (!%p24_p9) target bundleno = 34 (0x22), region = 61 }

</bundles_post_ra>
